<compile_context>
chip_gen: v6e
topology: v6e:2x2x1
jax: 0.10.0
libtpu: 0.0.40
codegen_flags: <defaults>
</compile_context>

<pallas_src>
import functools

import jax
import jax.numpy as jnp
from jax.experimental import pallas as pl
from jax.experimental.pallas import tpu as pltpu


def _round_up(x: int, m: int) -> int:
    return ((x + m - 1) // m) * m


def _choose_batch_tile(batch: int, block_b: int) -> int:
    """Batch tile: 16-aligned; one step for small batches, >=2 steps when batch>=256."""
    if batch < 256:
        return _round_up(batch, 16)           # single grid step (e.g. batch=32 -> tb=32)
    n_steps = max(2, -(-batch // block_b))    # >=2 so both v7x TensorCores get work
    return _round_up(-(-batch // n_steps), 16)


def mlp_kernel(x_ref, w1_ref, b1_ref, w2_ref, b2_ref, o_ref):
    # x arrives as f32 (4 B/elem HBM read, no wrapper-side cast copy); cast to
    # bf16 in-register for the MXU.
    x = x_ref[...].astype(jnp.bfloat16)
    # fc1: bf16 operands, f32 accumulation; bias + ReLU in f32.
    h = jnp.dot(x, w1_ref[...], preferred_element_type=jnp.float32)
    h = jnp.maximum(h + b1_ref[...], 0.0)
    # fc2: downcast activations to bf16 for the MXU, accumulate in f32.
    y = jnp.dot(h.astype(jnp.bfloat16), w2_ref[...],
                preferred_element_type=jnp.float32)
    o_ref[...] = (y + b2_ref[...]).astype(o_ref.dtype)
    # TODO(synk): apply_softmax flag of the reference forward() is unused; logits only.


def pack_params(w1, b1, w2, b2):
    """Pad + cast the weights ONCE (outside the per-forward hot path).

    Zero padding is exact: relu(0*x + 0) = 0 and padded output lanes are
    sliced off in the wrapper. Returns (packed_arrays, true_dims).
    """
    num_features, hidden = w1.shape
    out_features = w2.shape[1]
    fp = _round_up(num_features, 128)   # contraction dim of matmul #1
    hp = _round_up(hidden, 128)         # N of matmul #1 / K of matmul #2
    op = _round_up(out_features, 128)   # lane-dense output width

    w1_p = jnp.pad(w1, ((0, fp - num_features), (0, hp - hidden))).astype(jnp.bfloat16)
    b1_p = jnp.pad(b1.reshape(1, -1), ((0, 0), (0, hp - hidden))).astype(jnp.float32)
    w2_p = jnp.pad(w2, ((0, hp - hidden), (0, op - out_features))).astype(jnp.bfloat16)
    b2_p = jnp.pad(b2.reshape(1, -1), ((0, 0), (0, op - out_features))).astype(jnp.float32)
    return (w1_p, b1_p, w2_p, b2_p), (num_features, hidden, out_features)


@functools.partial(jax.jit, static_argnames=("dims", "block_b", "out_dtype"))
def classifier_forward(x, packed, dims, *, block_b=256, out_dtype=jnp.float32):
    """relu(x @ w1 + b1) @ w2 + b2 with pre-packed weights (see pack_params)."""
    w1_p, b1_p, w2_p, b2_p = packed
    num_features, hidden, out_features = dims
    batch = x.shape[0]
    fp, hp = w1_p.shape
    op = w2_p.shape[1]
    assert x.shape[1] == num_features

    tb = _choose_batch_tile(batch, block_b)
    bp = _round_up(batch, tb)
    grid = (bp // tb,)

    # Skip the x copy entirely when shapes are already aligned (common case:
    # 128-multiple feature dim, batch multiple of the tile). x stays f32.
    if bp != batch or fp != num_features:
        # Padded batch rows are zeros -> they produce relu(b1)@W2+b2 garbage rows
        # that are sliced off below (harmless, never observed by the caller).
        x_in = jnp.pad(x, ((0, bp - batch), (0, fp - num_features)))
    else:
        x_in = x

    out_itemsize = jnp.dtype(out_dtype).itemsize

    # Advisory cost estimate using TRUE (unpadded) dims.
    flops = 2 * batch * (num_features * hidden + hidden * out_features)
    bytes_accessed = (batch * num_features * 4
                      + w1_p.size * 2 + w2_p.size * 2
                      + b1_p.size * 4 + b2_p.size * 4
                      + batch * out_features * out_itemsize)

    # VMEM budget: double-buffered x / out tiles + (double-buffered) resident
    # weights, with headroom; explicit so v5e's 16 MiB / v7x's 32 MiB scoped
    # defaults don't bite at larger shapes.
    vmem_bytes = (2 * tb * fp * 4 + 2 * tb * op * out_itemsize
                  + 2 * (fp * hp * 2 + hp * 4 + hp * op * 2 + op * 4))
    vmem_limit = min(2 * vmem_bytes + (8 << 20), 64 << 20)
    # TODO(synk): for very large num_features (real tf-idf vocab) single-buffer
    # the constant-indexed weight specs (pipeline_mode=pl.Buffered(1)) or add a
    # K grid axis with an f32 VMEM accumulator to stay within v7x's 64 MiB VMEM.

    y_pad = pl.pallas_call(
        mlp_kernel,
        out_shape=jax.ShapeDtypeStruct((bp, op), out_dtype),
        grid=grid,
        in_specs=[
            pl.BlockSpec((tb, fp), lambda i: (i, 0)),   # x: streamed along batch (f32)
            pl.BlockSpec((fp, hp), lambda i: (0, 0)),   # W1: VMEM-resident
            pl.BlockSpec((1, hp),  lambda i: (0, 0)),   # b1: VMEM-resident
            pl.BlockSpec((hp, op), lambda i: (0, 0)),   # W2: VMEM-resident
            pl.BlockSpec((1, op),  lambda i: (0, 0)),   # b2: VMEM-resident
        ],
        out_specs=pl.BlockSpec((tb, op), lambda i: (i, 0)),
        compiler_params=pltpu.CompilerParams(
            dimension_semantics=("parallel",),          # megacore-shardable on v7x
            vmem_limit_bytes=vmem_limit),
        cost_estimate=pl.CostEstimate(
            flops=flops, transcendentals=0, bytes_accessed=bytes_accessed),
    )(x_in, w1_p, b1_p, w2_p, b2_p)

    if bp != batch or op != out_features:
        y_pad = y_pad[:batch, :out_features]
    return y_pad


def init_params(key, num_features, out_features, hidden=64):
    """nn.Linear-style uniform(-1/sqrt(fan_in), 1/sqrt(fan_in)); weights stored transposed."""
    k1, k2, k3, k4 = jax.random.split(key, 4)
    bound1 = 1.0 / (num_features ** 0.5)
    bound2 = 1.0 / (hidden ** 0.5)
    w1 = jax.random.uniform(k1, (num_features, hidden), jnp.float32, -bound1, bound1)
    b1 = jax.random.uniform(k2, (hidden,),              jnp.float32, -bound1, bound1)
    w2 = jax.random.uniform(k3, (hidden, out_features), jnp.float32, -bound2, bound2)
    b2 = jax.random.uniform(k4, (out_features,),        jnp.float32, -bound2, bound2)
    return w1, b1, w2, b2


if __name__ == "__main__":
    batch = 32
    num_features = 256   # tf-idf feature vector size (small synthetic choice)
    out_features = 16    # number of labels

    key = jax.random.PRNGKey(0)
    k_x, k_p = jax.random.split(key)
    x = jax.random.normal(k_x, (batch, num_features), dtype=jnp.float32)
    w1, b1, w2, b2 = init_params(k_p, num_features, out_features)

    # Pack weights ONCE outside the hot path (padding + bf16 cast).
    packed, dims = pack_params(w1, b1, w2, b2)
    packed = jax.block_until_ready(packed)

    # batch=32 -> single grid step with tb=32 (no tiny tb=8 steps); x is not
    # copied at all since 256 is already a 128 multiple and batch % tb == 0.
    y = classifier_forward(x, packed, dims)
    jax.block_until_ready(y)

    # Reference check in plain JAX (f32). bf16 MXU operands -> 2e-2 tolerance
    # is intentional; fine for classification logits.
    ref = jnp.maximum(x @ w1 + b1, 0.0) @ w2 + b2
    assert y.shape == (batch, out_features)
    assert jnp.allclose(y, ref, atol=2e-2, rtol=2e-2), float(jnp.abs(y - ref).max())

    print("KERNEL_OK")
</pallas_src>

<mosaic_0001>
module attributes {stable_mosaic.version = 11 : i64} {
  func.func @mlp_kernel(%arg0: i32, %arg1: memref<32x256xf32, #tpu.memory_space<vmem>>, %arg2: memref<256x128xbf16, #tpu.memory_space<vmem>>, %arg3: memref<1x128xf32, #tpu.memory_space<vmem>>, %arg4: memref<128x128xbf16, #tpu.memory_space<vmem>>, %arg5: memref<1x128xf32, #tpu.memory_space<vmem>>, %arg6: memref<32x128xf32, #tpu.memory_space<vmem>>) attributes {dimension_semantics = [#tpu.dimension_semantics<parallel>], iteration_bounds = array<i64: 1>, scalar_prefetch = 0 : i64, scratch_operands = 0 : i64, tpu.core_type = #tpu.core_type<tc>, window_params = [{transform_indices = @transform_0, window_bounds = array<i64: 32, 256>}, {pipeline_mode = #tpu.pipeline_mode<synchronous>, transform_indices = @transform_1, window_bounds = array<i64: 256, 128>}, {pipeline_mode = #tpu.pipeline_mode<synchronous>, transform_indices = @transform_2, window_bounds = array<i64: 1, 128>}, {pipeline_mode = #tpu.pipeline_mode<synchronous>, transform_indices = @transform_3, window_bounds = array<i64: 128, 128>}, {pipeline_mode = #tpu.pipeline_mode<synchronous>, transform_indices = @transform_4, window_bounds = array<i64: 1, 128>}, {transform_indices = @transform_5, window_bounds = array<i64: 32, 128>}]} {
    %c0 = arith.constant 0 : index
    %c0_0 = arith.constant 0 : index
    %0 = vector.load %arg1[%c0, %c0_0] : memref<32x256xf32, #tpu.memory_space<vmem>>, vector<32x256xf32>
    %1 = arith.truncf %0 : vector<32x256xf32> to vector<32x256xbf16>
    %c0_1 = arith.constant 0 : index
    %c0_2 = arith.constant 0 : index
    %2 = vector.load %arg2[%c0_1, %c0_2] : memref<256x128xbf16, #tpu.memory_space<vmem>>, vector<256x128xbf16>
    %cst = arith.constant dense<0.000000e+00> : vector<32x128xf32>
    %3 = tpu.matmul %1, %2, %cst {dimension_numbers = #tpu.dot_dimension_numbers<[1], [0], [0], [1], [0, 0, 1, 1], [], []>} : vector<32x256xbf16>, vector<256x128xbf16>, vector<32x128xf32> -> vector<32x128xf32>
    %c0_3 = arith.constant 0 : index
    %c0_4 = arith.constant 0 : index
    %4 = vector.load %arg3[%c0_3, %c0_4] : memref<1x128xf32, #tpu.memory_space<vmem>>, vector<1x128xf32>
    %5 = vector.broadcast %4 : vector<1x128xf32> to vector<32x128xf32>
    %6 = arith.addf %3, %5 : vector<32x128xf32>
    %cst_5 = arith.constant 0.000000e+00 : f32
    %7 = vector.broadcast %cst_5 : f32 to vector<32x128xf32>
    %8 = arith.maximumf %6, %7 : vector<32x128xf32>
    %9 = arith.truncf %8 : vector<32x128xf32> to vector<32x128xbf16>
    %c0_6 = arith.constant 0 : index
    %c0_7 = arith.constant 0 : index
    %10 = vector.load %arg4[%c0_6, %c0_7] : memref<128x128xbf16, #tpu.memory_space<vmem>>, vector<128x128xbf16>
    %cst_8 = arith.constant dense<0.000000e+00> : vector<32x128xf32>
    %11 = tpu.matmul %9, %10, %cst_8 {dimension_numbers = #tpu.dot_dimension_numbers<[1], [0], [0], [1], [0, 0, 1, 1], [], []>} : vector<32x128xbf16>, vector<128x128xbf16>, vector<32x128xf32> -> vector<32x128xf32>
    %c0_9 = arith.constant 0 : index
    %c0_10 = arith.constant 0 : index
    %12 = vector.load %arg5[%c0_9, %c0_10] : memref<1x128xf32, #tpu.memory_space<vmem>>, vector<1x128xf32>
    %13 = vector.broadcast %12 : vector<1x128xf32> to vector<32x128xf32>
    %14 = arith.addf %11, %13 : vector<32x128xf32>
    %c0_11 = arith.constant 0 : index
    %c0_12 = arith.constant 0 : index
    %15 = vector.load %arg6[%c0_11, %c0_12] : memref<32x128xf32, #tpu.memory_space<vmem>>, vector<32x128xf32>
    tpu.vector_store %arg6[%c0_11, %c0_12], %14 {strides = array<i32>} : memref<32x128xf32, #tpu.memory_space<vmem>>, vector<32x128xf32>,
    return
  }
  func.func @transform_0(%arg0: i32) -> (i32, i32) {
    %c0_i32 = arith.constant 0 : i32
    %c0_i32_0 = arith.constant 0 : i32
    return %arg0, %c0_i32 : i32, i32
  }
  func.func @transform_1(%arg0: i32) -> (i32, i32) {
    %c0_i32 = arith.constant 0 : i32
    %c0_i32_0 = arith.constant 0 : i32
    %c0_i32_1 = arith.constant 0 : i32
    return %c0_i32, %c0_i32_0 : i32, i32
  }
  func.func @transform_2(%arg0: i32) -> (i32, i32) {
    %c0_i32 = arith.constant 0 : i32
    %c0_i32_0 = arith.constant 0 : i32
    %c0_i32_1 = arith.constant 0 : i32
    return %c0_i32, %c0_i32_0 : i32, i32
  }
  func.func @transform_3(%arg0: i32) -> (i32, i32) {
    %c0_i32 = arith.constant 0 : i32
    %c0_i32_0 = arith.constant 0 : i32
    %c0_i32_1 = arith.constant 0 : i32
    return %c0_i32, %c0_i32_0 : i32, i32
  }
  func.func @transform_4(%arg0: i32) -> (i32, i32) {
    %c0_i32 = arith.constant 0 : i32
    %c0_i32_0 = arith.constant 0 : i32
    %c0_i32_1 = arith.constant 0 : i32
    return %c0_i32, %c0_i32_0 : i32, i32
  }
  func.func @transform_5(%arg0: i32) -> (i32, i32) {
    %c0_i32 = arith.constant 0 : i32
    %c0_i32_0 = arith.constant 0 : i32
    return %arg0, %c0_i32 : i32, i32
  }
}

</mosaic_0001>

<bundles_post_ra>
// kernel: classifier_forward.1
= control target key start
LH: loop header
LB: loop body
LE: loop exit
PB: predicated region body
PF: predicated region fallthrough
CT: control target
= control target key end

     0   :  { %10 = vsyncpa [#allocation3], 0  ;;  %s637_s0 = inlined_call_operand.hbm [shape: f32[32,256], index: 0, kind: input, shape index: {}]   ;;  %s638_s1 = inlined_call_operand.hbm [shape: bf16[256,128], index: 1, kind: input, shape index: {}]   ;;  %s639_s2 = inlined_call_operand.vmem [shape: f32[1,128], index: 2, kind: input, shape index: {}]   ;;  %s640_s3 = inlined_call_operand.hbm [shape: bf16[128,128], index: 3, kind: input, shape index: {}]   ;;  %s641_s4 = inlined_call_operand.vmem [shape: f32[1,128], index: 4, kind: input, shape index: {}]   ;;  %s642_s5 = inlined_call_operand.vmem [shape: f32[32,128], index: 5, kind: output, shape index: {}]  }
   0x1   :  { %11 = vsyncpa [#allocation5], 0  ;;  %s573_s18 = smov [#allocation4]  }
   0x2   :  { %s29_s19 = sshll.u32 %s573_s18, 4  ;;  %s30_s19 = int_to_ptr.vmem [resolvable:$true] %s29_s19 }
   0x3   :  { %s517_s20 = scalar_lea.vmem %s30_s19, 2048  ;;  %p522_p1 = scmp.lt.s32.totalorder %s30_s19, %s30_s19 }
   0x4   :  { %p518_p0 = scmp.ne.s32.totalorder %s30_s19, %s517_s20  ;;  %p523_p2 = scmp.lt.s32.totalorder %s517_s20, %s517_s20 }
   0x6   :  { %p524_p3 = por %p523_p2, %p522_p1 }
   0x8   :  { %p525_p4 = pnand %p524_p3, %p518_p0 }
   0xa   :  { %528 = shalt.err (!%p525_p4)
}
   0xb   :  { %s574_s21 = smov 64   ;;  %s575_s22 = smov 4  }
   0xc   :  { %35 = dma.hbm_to_vmem [thread:$0]  %s638_s1, 2048, %s30_s19, [#allocation5], %s574_s21, %s574_s21, %s575_s22  }
   0xd   :  { %s576_s25 = smov [#allocation2]  }
   0xe   :  { %s17_s26 = sshll.u32 %s576_s25, 4  ;;  %s18_s26 = int_to_ptr.vmem [resolvable:$true] %s17_s26 }
   0xf   :  { %s537_s27 = scalar_lea.vmem %s18_s26, 1024  ;;  %p542_p6 = scmp.lt.s32.totalorder %s18_s26, %s18_s26 }
  0x10   :  { %p538_p5 = scmp.ne.s32.totalorder %s18_s26, %s537_s27  ;;  %p543_p7 = scmp.lt.s32.totalorder %s537_s27, %s537_s27 }
  0x12   :  { %p544_p8 = por %p543_p7, %p542_p6 }
  0x14   :  { %p545_p9 = pnand %p544_p8, %p538_p5 }
  0x16   :  { %548 = shalt.err (!%p545_p9)
}
  0x17   :  { %s577_s28 = smov 256   ;;  %s578_s29 = smov 16  }
  0x18   :  { %23 = dma.hbm_to_vmem [thread:$0]  %s637_s0, 1024, %s18_s26, [#allocation3], %s577_s28, %s577_s28, %s578_s29  }
  0x19   :  { %s579_s7 = smov [#allocation6]  }
  0x1a   :  { %s43_s8 = sshll.u32 %s579_s7, 4  ;;  %s44_s8 = int_to_ptr.vmem [resolvable:$true] %s43_s8 }
  0x1b   :  { %s557_s1 = scalar_lea.vmem %s44_s8, 1024  ;;  %p562_p11 = scmp.lt.s32.totalorder %s44_s8, %s44_s8 }
  0x1c   :  { %p558_p10 = scmp.ne.s32.totalorder %s44_s8, %s557_s1  ;;  %p563_p12 = scmp.lt.s32.totalorder %s557_s1, %s557_s1 }
  0x1e   :  { %p564_p13 = por %p563_p12, %p562_p11 }
  0x20   :  { %p565_p0 = pnand %p564_p13, %p558_p10 }
  0x22   :  { %568 = shalt.err (!%p565_p0)
}
  0x23   :  { %49 = dma.hbm_to_vmem [thread:$0]  %s640_s3, 1024, %s44_s8, [#allocation5], %s574_s21, %s574_s21, %s575_s22  }
  0x24   :  { %569 = dma.done.wait [#allocation3], 1024  }
  0x25   :  { %570 = vsyncadd [#allocation3], 4294966272 }
  0x26   :  { %571 = dma.done.wait [#allocation5], 3072  }
  0x27   :  { %572 = vsyncadd [#allocation5], 4294964224  ;;  %v485_v0 = vld [vmem:[#allocation4 + $0x78] sm:$0xff]   ;;  %v487_v2 = vld [vmem:[#allocation4 + $0x70] sm:$0xff]  }
  0x28   :  { %v486_v1 = vld [vmem:[#allocation4 + $0x38] sm:$0xff]   ;;  %420 = vmatprep.subr.bf16.mxu0 %v485_v0  ;;  %v488_v3 = vld [vmem:[#allocation4 + $0x30] sm:$0xff]   ;;  %v489_v4 = vld [vmem:[#allocation4 + $0x68] sm:$0xff]  }
  0x29   :  { %421 = vmatpush3.bf16.msra.mxu0 %v486_v1  ;;  %v490_v5 = vld [vmem:[#allocation4 + $0x28] sm:$0xff]   ;;  %v491_v6 = vld [vmem:[#allocation4 + $0x60] sm:$0xff]   ;;  %v493_v8 = vld [vmem:[#allocation4 + $0x58] sm:$0xff]  }
  0x2a   :  { %422 = vmatprep.subr.bf16.mxu0 %v487_v2  ;;  %v492_v7 = vld [vmem:[#allocation4 + $0x20] sm:$0xff]   ;;  %v494_v9 = vld [vmem:[#allocation4 + $0x18] sm:$0xff]   ;;  %v495_v10 = vld [vmem:[#allocation4 + $0x50] sm:$0xff]  }
  0x2b   :  { %v63_v11 = vld [vmem:[#allocation2 + $0x8] sm:$0xff]  ;;  %v65_v12 = vld [vmem:[#allocation2 + $0x18] sm:$0xff]  ;;  %v496_v14 = vld [vmem:[#allocation4 + $0x10] sm:$0xff]  }
  0x2c   :  { %v71_v13 = vpack.c.bf16 %v65_v12, %v63_v11  ;;  %v497_v15 = vld [vmem:[#allocation4 + $0x48] sm:$0xff]   ;;  %v501_v16 = vld [vmem:[#allocation6 + $0x38] sm:$0xff]   ;;  %v502_v17 = vld [vmem:[#allocation6 + $0x30] sm:$0xff]  }
  0x2d   :  { %423 = vmatpush3.bf16.msra.mxu0 %v488_v3  ;;  %v498_v18 = vld [vmem:[#allocation4 + $0x8] sm:$0xff]   ;;  %458 = vmatprep.subr.bf16.mxu1 %v501_v16  ;;  %v499_v20 = vld [vmem:[#allocation4 + $0x40] sm:$0xff]   ;;  %v64_v23 = vld [vmem:[#allocation2 + $0x10] sm:$0xff] }
  0x2e   :  { %424 = vmatprep.subr.bf16.mxu0 %v489_v4  ;;  %241 = vmatprep.mubr.bf16.mxu0 %v71_v13  ;;  %v503_v19 = vld [vmem:[#allocation6 + $0x28] sm:$0xff]   ;;  %v500_v21 = vld [vmem:[#allocation4] sm:$0xff]   ;;  %v69_v25 = vld [vmem:[#allocation2 + $0x38] sm:$0xff] }
  0x2f   :  { %459 = vmatpush3.bf16.msra.mxu1 %v501_v16  ;;  %v62_v22 = vld [vmem:[#allocation2] sm:$0xff]  ;;  %v67_v24 = vld [vmem:[#allocation2 + $0x28] sm:$0xff]  ;;  %v68_v29 = vld [vmem:[#allocation2 + $0x30] sm:$0xff] }
  0x30   :  { %460 = vmatprep.subr.bf16.mxu1 %v502_v17  ;;  %v70_v26 = vpack.c.bf16 %v64_v23, %v62_v22  ;;  %v73_v27 = vpack.c.bf16 %v69_v25, %v67_v24  ;;  %v66_v28 = vld [vmem:[#allocation2 + $0x20] sm:$0xff]  ;;  %v505_v32 = vld [vmem:[#allocation6 + $0x18] sm:$0xff]   ;;  %v506_v33 = vld [vmem:[#allocation6 + $0x10] sm:$0xff]  }
  0x31   :  { %425 = vmatpush3.bf16.msra.mxu0 %v490_v5  ;;  %v72_v30 = vpack.c.bf16 %v68_v29, %v66_v28  ;;  %v504_v31 = vld [vmem:[#allocation6 + $0x20] sm:$0xff]   ;;  %v507_v34 = vld [vmem:[#allocation6 + $0x8] sm:$0xff]  }
  0x32   :  { %426 = vmatprep.subr.bf16.mxu0 %v491_v6  ;;  %v508_v35 = vld [vmem:[#allocation6] sm:$0xff]  }
  0x33   :  { %461 = vmatpush3.bf16.msra.mxu1 %v502_v17  ;;  %v394_v40 = vld [vmem:[%s639_s2] ss:$0 sm:$0xff] }
  0x34   :  { %462 = vmatprep.subr.bf16.mxu1 %v503_v19  ;;  %v411_v59 = vld [vmem:[%s641_s4] ss:$0 sm:$0xff] }
  0x35   :  { %427 = vmatpush3.bf16.msra.mxu0 %v492_v7 }
  0x36   :  { %428 = vmatprep.subr.bf16.mxu0 %v493_v8 }
  0x37   :  { %463 = vmatpush3.bf16.msra.mxu1 %v503_v19 }
  0x38   :  { %464 = vmatprep.subr.bf16.mxu1 %v504_v31 }
  0x39   :  { %429 = vmatpush3.bf16.msra.mxu0 %v494_v9 }
  0x3a   :  { %430 = vmatprep.subr.bf16.mxu0 %v495_v10 }
  0x3b   :  { %465 = vmatpush3.bf16.msra.mxu1 %v504_v31 }
  0x3c   :  { %466 = vmatprep.subr.bf16.mxu1 %v505_v32 }
  0x3d   :  { %431 = vmatpush3.bf16.msra.mxu0 %v496_v14 }
  0x3e   :  { %432 = vmatprep.subr.bf16.mxu0 %v497_v15 }
  0x3f   :  { %467 = vmatpush3.bf16.msra.mxu1 %v505_v32 }
  0x40   :  { %468 = vmatprep.subr.bf16.mxu1 %v506_v33 }
  0x41   :  { %433 = vmatpush3.bf16.msra.mxu0 %v498_v18 }
  0x42   :  { %434 = vmatprep.subr.bf16.mxu0 %v499_v20 }
  0x43   :  { %469 = vmatpush3.bf16.msra.mxu1 %v506_v33 }
  0x44   :  { %470 = vmatprep.subr.bf16.mxu1 %v507_v34 }
  0x45   :  { %435 = vmatpush3.bf16.msra.mxu0 %v500_v21 }
  0x47   :  { %471 = vmatpush3.bf16.msra.mxu1 %v507_v34 }
  0x48   :  { %242 = vmatmul.mubr.bf16.vlgmr.msra.gmra.mxu0 %v70_v26  ;;  %472 = vmatprep.subr.bf16.mxu1 %v508_v35 }
  0x49   :  { %249 = vmatprep.mubr.bf16.mxu0 %v73_v27 }
  0x4b   :  { %473 = vmatpush3.bf16.msra.mxu1 %v508_v35 }
  0x50   :  { %250 = vmatmul.mubr.bf16.gmra.mxu0 %v72_v30 }
 0x108   :  { %v436_v36 = vpop.f32.mrf.mxu0 }
 0x10a   :  { %v437_v37 = vpop.f32.mrf.mxu0 }
 0x10b   :  { %v438_v38 = vadd.f32 %v437_v37, %v436_v36 }
 0x10c   :  { %v439_v39 = vpop.f32.mrf.mxu0 }
 0x10d   :  { %v244_v43 = vadd.f32 %v438_v38, %v394_v40 }
 0x10e   :  { %v440_v41 = vpop.f32.mrf.mxu0 }
 0x10f   :  { %v441_v42 = vadd.f32 %v440_v41, %v439_v39  ;;  %v258_v48 = vmax.f32 %v244_v43, 0.0 }
 0x110   :  { %v442_v44 = vpop.f32.mrf.mxu0 }
 0x111   :  { %v247_v45 = vadd.f32 %v441_v42, %v394_v40 }
 0x112   :  { %v443_v46 = vpop.f32.mrf.mxu0 }
 0x113   :  { %v444_v47 = vadd.f32 %v443_v46, %v442_v44  ;;  %v259_v49 = vmax.f32 %v247_v45, 0.0 }
 0x114   :  { %v445_v50 = vpop.f32.mrf.mxu0 }
 0x115   :  { %v262_v51 = vpack.c.bf16 %v259_v49, %v258_v48  ;;  %v252_v53 = vadd.f32 %v444_v47, %v394_v40 }
 0x116   :  { %v446_v52 = vpop.f32.mrf.mxu0 }
 0x117   :  { %v447_v54 = vadd.f32 %v446_v52, %v445_v50  ;;  %474 = vmatprep.mubr.bf16.mxu1 %v262_v51  ;;  %v260_v56 = vmax.f32 %v252_v53, 0.0 }
 0x119   :  { %v255_v55 = vadd.f32 %v447_v54, %v394_v40 }
 0x11b   :  { %v261_v57 = vmax.f32 %v255_v55, 0.0 }
 0x11d   :  { %v263_v58 = vpack.c.bf16 %v261_v57, %v260_v56 }
 0x11f   :  { %475 = vmatmul.mubr.bf16.vlgmr.msra.gmra.mxu1 %v263_v58 }
 0x1df   :  { %v476_v60 = vpop.f32.mrf.mxu1 }
 0x1e0   :  { %v378_v61 = vadd.f32 %v476_v60, %v411_v59 }
 0x1e1   :  { %v369_v62 = vpop.f32.mrf.mxu1 }
 0x1e2   :  { %386 = vst [vmem:[%s642_s5 + $0x10] sm:$0xff] %v378_v61  ;;  %v370_v63 = vadd.f32 %v411_v59, %v369_v62 }
 0x1e3   :  { %v477_v0 = vpop.f32.mrf.mxu1 }
 0x1e4   :  { %384 = vst [vmem:[%s642_s5] sm:$0xff] %v370_v63  ;;  %v381_v1 = vadd.f32 %v477_v0, %v411_v59 }
 0x1e5   :  { %v372_v2 = vpop.f32.mrf.mxu1 }
 0x1e6   :  { %387 = vst [vmem:[%s642_s5 + $0x18] sm:$0xff] %v381_v1  ;;  %v373_v3 = vadd.f32 %v411_v59, %v372_v2 }
 0x1e8   :  { %385 = vst [vmem:[%s642_s5 + $0x8] sm:$0xff] %v373_v3 }
 0x1e9   :  { %392 = vsyncpa [#allocation3], 1 }
 0x1ea   :  { %393 = vsyncpa [#allocation5], 1 }

</bundles_post_ra>
